<compile_context>
chip_gen: v7x
topology: tpu7x:2x2x1
jax: 0.10.0
libtpu: 0.0.40
codegen_flags: <defaults>
</compile_context>

<pallas_src>
import math

import jax
import jax.numpy as jnp
from jax import lax
from jax.experimental import pallas as pl
from jax.experimental.pallas import tpu as pltpu


def _round_up(x, m):
    return ((x + m - 1) // m) * m


def _chip_kind():
    try:
        return jax.devices()[0].device_kind.lower()
    except Exception:
        return ""


def _hw_config(batch):
    kind = _chip_kind()
    is_v7 = "v7" in kind
    # 2 TensorCores per chip only on v7x; on 1-TC chips (v5e/v6e) the extra
    # "parallel" axis only fragments the batch.
    num_parallel = 2 if (is_v7 and batch >= 16) else 1
    if is_v7:
        # 64 MiB physical VMEM per TC: keep the working set ~24 MiB, cap at 48 MiB.
        budget, vmem_limit = 24 * 1024 * 1024, 48 * 1024 * 1024
    else:
        # 128 MiB physical VMEM: large tiles (~512 rows) reach ~85% of HBM roofline.
        budget, vmem_limit = 32 * 1024 * 1024, 64 * 1024 * 1024
    return num_parallel, budget, vmem_limit


def _choose_tb(B, D, per_row_bytes, fixed_bytes, budget, num_parallel):
    avail = max(budget - fixed_bytes, per_row_bytes * 8)
    tb = (avail // per_row_bytes // 8) * 8
    tb = max(8, min(1024, tb))
    per_core = -(-B // num_parallel)
    tb = min(tb, max(8, _round_up(per_core, 8)))
    return tb


def center_loss(labels, feat, centers, *, force_pregather=False):
    """labels: (B,) int, feat: (B, D) float (native dtype), centers: (C, D) f32 -> scalar f32."""
    B, D = feat.shape
    C, Dc = centers.shape
    if Dc != D:
        raise ValueError(
            "Center's dim: {0} should be equal to input feature's dim: {1}".format(Dc, D)
        )
    labels = labels.astype(jnp.int32)

    num_parallel, budget, vmem_limit = _hw_config(B)
    itemsize = feat.dtype.itemsize
    centers_bytes = C * D * 4

    # Resident-centers in-kernel gather whenever the table comfortably fits VMEM.
    gather_in_kernel = (not force_pregather) and (centers_bytes <= budget // 2)

    if gather_in_kernel:
        # double-buffered feat + labels streams, plus f32 csel/diff/sq temporaries.
        per_row = 2 * D * itemsize + 2 * 4 + 3 * D * 4
        fixed = centers_bytes + 2 * 8 * D * 4
    else:
        # double-buffered feat + csel streams (feat dtype), plus f32 diff/sq temporaries.
        per_row = 4 * D * itemsize + 2 * D * 4
        fixed = 2 * 8 * D * 4

    tb = _choose_tb(B, D, per_row, fixed, budget, num_parallel)
    nsteps = -(-B // (num_parallel * tb))
    covered = num_parallel * nsteps * tb
    need_mask = covered != B
    last_blk = -(-B // tb) - 1  # last valid (possibly partial) batch block

    def row_block(c, i):
        # Clamp so a fully out-of-range step just re-reads the last valid block;
        # its contribution is masked to exactly zero inside the kernel.
        return (jnp.minimum(c * nsteps + i, last_blk), 0)

    if gather_in_kernel:

        def kernel(feat_ref, lab_ref, cent_ref, out_ref):
            i = pl.program_id(1)

            @pl.when(i == 0)
            def _():
                out_ref[...] = jnp.zeros_like(out_ref)

            lab = lab_ref[...]  # (tb, 1) int32
            onehot = lax.broadcasted_iota(jnp.int32, (tb, C), 1) == lab
            # Gather the tb center rows on the (otherwise idle) MXU.
            csel = jnp.dot(
                onehot.astype(jnp.float32), cent_ref[...],
                preferred_element_type=jnp.float32)  # (tb, D) f32
            d = feat_ref[...].astype(jnp.float32) - csel
            sq = d * d
            if need_mask:
                base = (pl.program_id(0) * nsteps + i) * tb
                row = base + lax.broadcasted_iota(jnp.int32, (tb, 1), 0)
                sq = jnp.where(row < B, sq, 0.0)
            # (tb, D) -> (tb//8, 8, D); summing the leading axis is pure VPU adds.
            out_ref[...] += jnp.sum(sq.reshape(tb // 8, 8, D), axis=0)

        operands = (feat, labels.reshape(B, 1), centers.astype(jnp.float32))
        in_specs = [
            pl.BlockSpec((tb, D), row_block),                 # feat tile
            pl.BlockSpec((tb, 1), row_block),                 # label tile
            pl.BlockSpec((C, D), lambda c, i: (0, 0)),        # resident centers table
        ]
        flops = 3 * B * D + 2 * B * C * D
        bytes_accessed = B * D * itemsize + B * 4 + centers_bytes + num_parallel * 8 * D * 4
    else:
        # Fallback for very large (C, D): pre-gather per-sample centers in feat's
        # dtype (halves the second stream for bf16 features) and stream densely.
        csel = jnp.take(centers, labels, axis=0).astype(feat.dtype)

        def kernel(feat_ref, csel_ref, out_ref):
            i = pl.program_id(1)

            @pl.when(i == 0)
            def _():
                out_ref[...] = jnp.zeros_like(out_ref)

            d = feat_ref[...].astype(jnp.float32) - csel_ref[...].astype(jnp.float32)
            sq = d * d
            if need_mask:
                base = (pl.program_id(0) * nsteps + i) * tb
                row = base + lax.broadcasted_iota(jnp.int32, (tb, 1), 0)
                sq = jnp.where(row < B, sq, 0.0)
            out_ref[...] += jnp.sum(sq.reshape(tb // 8, 8, D), axis=0)

        operands = (feat, csel)
        in_specs = [
            pl.BlockSpec((tb, D), row_block),
            pl.BlockSpec((tb, D), row_block),
        ]
        flops = 3 * B * D
        bytes_accessed = 2 * B * D * itemsize + num_parallel * 8 * D * 4

    out = pl.pallas_call(
        kernel,
        out_shape=jax.ShapeDtypeStruct((num_parallel * 8, D), jnp.float32),
        grid_spec=pltpu.PrefetchScalarGridSpec(
            num_scalar_prefetch=0,
            grid=(num_parallel, nsteps),
            in_specs=in_specs,
            out_specs=pl.BlockSpec((8, D), lambda c, i: (c, 0)),  # resident accumulator
        ),
        compiler_params=pltpu.CompilerParams(
            dimension_semantics=("parallel", "arbitrary"),
            vmem_limit_bytes=vmem_limit,
        ),
        cost_estimate=pl.CostEstimate(
            flops=int(flops), transcendentals=0, bytes_accessed=int(bytes_accessed)),
    )(*operands)

    # Single final cross-lane/cross-sublane reduce + the /2 from the reference.
    return 0.5 * jnp.sum(out)


def init_centers(key, num_classes, feat_dim):
    # Mirrors nn.init.kaiming_normal_(centers, mode='fan_out', nonlinearity='leaky_relu'):
    # for a 2-D (num_classes, feat_dim) tensor fan_out = num_classes,
    # gain = sqrt(2 / (1 + 0.01**2)), std = gain / sqrt(fan_out).
    gain = math.sqrt(2.0 / (1.0 + 0.01 ** 2))
    std = gain / math.sqrt(num_classes)
    return std * jax.random.normal(key, (num_classes, feat_dim), dtype=jnp.float32)


class CenterLossPallas:
    def __init__(self, num_classes, feat_dim, key):
        self.num_classes = num_classes
        self.feat_dim = feat_dim
        self.centers = init_centers(key, num_classes, feat_dim)

    def __call__(self, y, feat):
        batch_size = feat.shape[0]
        # feat.view(B,1,1,-1).squeeze() -> (B, feat_dim)
        feat2d = feat.reshape(batch_size, -1)
        if feat2d.shape[1] != self.feat_dim:
            raise ValueError(
                "Center's dim: {0} should be equal to input feature's dim: {1}".format(
                    self.feat_dim, feat2d.shape[1]
                )
            )
        return center_loss(y, feat2d, self.centers)


if __name__ == "__main__":
    key = jax.random.PRNGKey(0)
    k1, k2, k3, k4, k5 = jax.random.split(key, 5)

    # Case 1: module-default small shapes (exercises the resident-centers
    # in-kernel gather path).
    num_classes, feat_dim, batch = 10, 32, 8
    module = CenterLossPallas(num_classes, feat_dim, k1)
    feat = jax.random.normal(k2, (batch, feat_dim), dtype=jnp.float32)
    labels = jax.random.randint(k3, (batch,), 0, num_classes, dtype=jnp.int32)
    loss = module(labels, feat)
    jax.block_until_ready(loss)
    ref = 0.5 * jnp.sum((feat - module.centers[labels]) ** 2)
    assert jnp.allclose(loss, ref, rtol=1e-5, atol=1e-4), (loss, ref)

    # Case 2: ragged batch (20 rows -> in-kernel tail masking, no padding copies)
    # with lane-aligned D; run both the gather path and the pre-gather fallback.
    C2, D2, B2 = 12, 128, 20
    centers2 = init_centers(k4, C2, D2)
    feat2 = jax.random.normal(k5, (B2, D2), dtype=jnp.float32)
    labels2 = jax.random.randint(k3, (B2,), 0, C2, dtype=jnp.int32)
    ref2 = 0.5 * jnp.sum((feat2 - centers2[labels2]) ** 2)
    loss2a = center_loss(labels2, feat2, centers2)
    loss2b = center_loss(labels2, feat2, centers2, force_pregather=True)
    jax.block_until_ready((loss2a, loss2b))
    assert jnp.allclose(loss2a, ref2, rtol=1e-5, atol=1e-4), (loss2a, ref2)
    assert jnp.allclose(loss2b, ref2, rtol=1e-5, atol=1e-4), (loss2b, ref2)

    print("KERNEL_OK")
</pallas_src>

<mosaic_0001>
module attributes {stable_mosaic.version = 11 : i64} {
  func.func @kernel(%arg0: i32, %arg1: i32, %arg2: memref<8x32xf32, #tpu.memory_space<vmem>>, %arg3: memref<8x1xi32, #tpu.memory_space<vmem>>, %arg4: memref<10x32xf32, #tpu.memory_space<vmem>>, %arg5: memref<8x32xf32, #tpu.memory_space<vmem>>) attributes {dimension_semantics = [#tpu.dimension_semantics<parallel>, #tpu.dimension_semantics<arbitrary>], iteration_bounds = array<i64: 1, 1>, scalar_prefetch = 0 : i64, scratch_operands = 0 : i64, tpu.core_type = #tpu.core_type<tc>, window_params = [{transform_indices = @transform_0, window_bounds = array<i64: 8, 32>}, {transform_indices = @transform_1, window_bounds = array<i64: 8, 1>}, {pipeline_mode = #tpu.pipeline_mode<synchronous>, transform_indices = @transform_2, window_bounds = array<i64: 10, 32>}, {transform_indices = @transform_3, window_bounds = array<i64: 8, 32>}]} {
    %c0_i32 = arith.constant 0 : i32
    %0 = arith.cmpi eq, %arg1, %c0_i32 : i32
    %1 = arith.extui %0 : i1 to i32
    %c0_i32_0 = arith.constant 0 : i32
    %2 = arith.cmpi ne, %1, %c0_i32_0 : i32
    scf.if %2 {
      %cst_11 = arith.constant 0.000000e+00 : f32
      %19 = vector.broadcast %cst_11 : f32 to vector<8x32xf32>
      %c0_12 = arith.constant 0 : index
      %c0_13 = arith.constant 0 : index
      %20 = vector.load %arg5[%c0_12, %c0_13] : memref<8x32xf32, #tpu.memory_space<vmem>>, vector<8x32xf32>
      tpu.vector_store %arg5[%c0_12, %c0_13], %19 {strides = array<i32>} : memref<8x32xf32, #tpu.memory_space<vmem>>, vector<8x32xf32>,
    } else {
    }
    %c0 = arith.constant 0 : index
    %c0_1 = arith.constant 0 : index
    %3 = vector.load %arg3[%c0, %c0_1] : memref<8x1xi32, #tpu.memory_space<vmem>>, vector<8x1xi32>
    %4 = tpu.iota {dimensions = array<i32: 1>} : vector<8x10xi32>
    %5 = vector.broadcast %3 : vector<8x1xi32> to vector<8x10xi32>
    %6 = arith.cmpi eq, %4, %5 : vector<8x10xi32>
    %7 = arith.extui %6 : vector<8x10xi1> to vector<8x10xi32>
    %8 = arith.sitofp %7 : vector<8x10xi32> to vector<8x10xf32>
    %c0_2 = arith.constant 0 : index
    %c0_3 = arith.constant 0 : index
    %9 = vector.load %arg4[%c0_2, %c0_3] : memref<10x32xf32, #tpu.memory_space<vmem>>, vector<10x32xf32>
    %cst = arith.constant dense<0.000000e+00> : vector<8x32xf32>
    %10 = tpu.matmul %8, %9, %cst {dimension_numbers = #tpu.dot_dimension_numbers<[1], [0], [0], [1], [0, 0, 1, 1], [], []>} : vector<8x10xf32>, vector<10x32xf32>, vector<8x32xf32> -> vector<8x32xf32>
    %c0_4 = arith.constant 0 : index
    %c0_5 = arith.constant 0 : index
    %11 = vector.load %arg2[%c0_4, %c0_5] : memref<8x32xf32, #tpu.memory_space<vmem>>, vector<8x32xf32>
    %12 = arith.subf %11, %10 : vector<8x32xf32>
    %13 = arith.mulf %12, %12 : vector<8x32xf32>
    %c0_6 = arith.constant 0 : index
    %c0_7 = arith.constant 0 : index
    %14 = vector.load %arg5[%c0_6, %c0_7] : memref<8x32xf32, #tpu.memory_space<vmem>>, vector<8x32xf32>
    %15 = vector.shape_cast %13 : vector<8x32xf32> to vector<1x8x32xf32>
    %cst_8 = arith.constant dense<0.000000e+00> : vector<8x32xf32>
    %16 = vector.multi_reduction <add>, %15, %cst_8 [0] : vector<1x8x32xf32> to vector<8x32xf32>
    %17 = arith.addf %14, %16 : vector<8x32xf32>
    %c0_9 = arith.constant 0 : index
    %c0_10 = arith.constant 0 : index
    %18 = vector.load %arg5[%c0_9, %c0_10] : memref<8x32xf32, #tpu.memory_space<vmem>>, vector<8x32xf32>
    tpu.vector_store %arg5[%c0_9, %c0_10], %17 {strides = array<i32>} : memref<8x32xf32, #tpu.memory_space<vmem>>, vector<8x32xf32>,
    return
  }
  func.func @transform_0(%arg0: i32, %arg1: i32) -> (i32, i32) {
    %c1_i32 = arith.constant 1 : i32
    %0 = arith.muli %arg0, %c1_i32 : i32
    %1 = arith.addi %0, %arg1 : i32
    %c0_i32 = arith.constant 0 : i32
    %2 = arith.minsi %1, %c0_i32 : i32
    %c0_i32_0 = arith.constant 0 : i32
    %c0_i32_1 = arith.constant 0 : i32
    return %2, %c0_i32_0 : i32, i32
  }
  func.func @transform_1(%arg0: i32, %arg1: i32) -> (i32, i32) {
    %c1_i32 = arith.constant 1 : i32
    %0 = arith.muli %arg0, %c1_i32 : i32
    %1 = arith.addi %0, %arg1 : i32
    %c0_i32 = arith.constant 0 : i32
    %2 = arith.minsi %1, %c0_i32 : i32
    %c0_i32_0 = arith.constant 0 : i32
    %c0_i32_1 = arith.constant 0 : i32
    return %2, %c0_i32_0 : i32, i32
  }
  func.func @transform_2(%arg0: i32, %arg1: i32) -> (i32, i32) {
    %c0_i32 = arith.constant 0 : i32
    %c0_i32_0 = arith.constant 0 : i32
    %c0_i32_1 = arith.constant 0 : i32
    return %c0_i32, %c0_i32_0 : i32, i32
  }
  func.func @transform_3(%arg0: i32, %arg1: i32) -> (i32, i32) {
    %c0_i32 = arith.constant 0 : i32
    %c0_i32_0 = arith.constant 0 : i32
    return %arg0, %c0_i32 : i32, i32
  }
}

</mosaic_0001>

<bundles_post_ra>
// kernel: tpu_custom_call.1
= control target key start
LH: loop header
LB: loop body
LE: loop exit
PB: predicated region body
PF: predicated region fallthrough
CT: control target
= control target key end

     0   :  { %8 = vsyncpa [#allocation3], 0  ;;  %s395_s0 = inlined_call_operand.hbm [shape: f32[8,32], index: 0, kind: input, shape index: {}]   ;;  %s396_s1 = inlined_call_operand.hbm [shape: s32[8,1], index: 1, kind: input, shape index: {}]   ;;  %s397_s2 = inlined_call_operand.hbm [shape: f32[10,32], index: 2, kind: input, shape index: {}]   ;;  %s398_s3 = inlined_call_operand.hbm [shape: f32[8,32], index: 3, kind: output, shape index: {}]  }
   0x1   :  { %9 = vsyncpa [#allocation6], 0 }
   0x2   :  { %10 = vsyncpa [#allocation4], 0  ;;  %s314_s12 = smov [#allocation5]   ;;  %s315_s14 = smov [#allocation2]  }
   0x3   :  { %s37_s13 = sshll.u32 %s314_s12, 4  ;;  %s22_s15 = sshll.u32 %s315_s14, 4  ;;  %s38_s13 = int_to_ptr.vmem [resolvable:$true] %s37_s13  ;;  %s23_s15 = int_to_ptr.vmem [resolvable:$true] %s22_s15 }
   0x4   :  { %s220_s18 = scalar_lea.hbm %s396_s1, 128 }
   0x5   :  { %p221_p0 = scmp.ne.s32.totalorder %s396_s1, %s220_s18  ;;  %p224_p1 = scmp.lt.u32.totalorder %s220_s18, %s396_s1 }
   0x7   :  { %p226_p2 = pnand %p224_p1, %p221_p0 }
   0x9   :  { %229 = shalt.err (!%p226_p2)
}
   0xa   :  { %s230_s23 = scalar_lea.vmem %s38_s13, 128  ;;  %p235_p4 = scmp.lt.s32.totalorder %s38_s13, %s38_s13 }
   0xb   :  { %p231_p3 = scmp.ne.s32.totalorder %s38_s13, %s230_s23  ;;  %p236_p5 = scmp.lt.s32.totalorder %s230_s23, %s230_s23 }
   0xd   :  { %p237_p6 = por %p236_p5, %p235_p4 }
   0xf   :  { %p238_p7 = pnand %p237_p6, %p231_p3 }
  0x11   :  { %241 = shalt.err (!%p238_p7)
}
  0x12   :  { %40 = dma.hbm_to_vmem [thread:$0]  %s396_s1, 128, %s38_s13, [#allocation6]  }
  0x13   :  { %s242_s28 = scalar_lea.hbm %s395_s0, 128 }
  0x14   :  { %p243_p8 = scmp.ne.s32.totalorder %s395_s0, %s242_s28  ;;  %p246_p9 = scmp.lt.u32.totalorder %s242_s28, %s395_s0 }
  0x16   :  { %p248_p10 = pnand %p246_p9, %p243_p8 }
  0x18   :  { %251 = shalt.err (!%p248_p10)
}
  0x19   :  { %s252_s6 = scalar_lea.vmem %s23_s15, 128  ;;  %p257_p12 = scmp.lt.s32.totalorder %s23_s15, %s23_s15 }
  0x1a   :  { %p253_p11 = scmp.ne.s32.totalorder %s23_s15, %s252_s6  ;;  %p258_p13 = scmp.lt.s32.totalorder %s252_s6, %s252_s6 }
  0x1c   :  { %p259_p0 = por %p258_p13, %p257_p12 }
  0x1e   :  { %p260_p1 = pnand %p259_p0, %p253_p11 }
  0x20   :  { %263 = shalt.err (!%p260_p1)
}
  0x21   :  { %25 = dma.hbm_to_vmem [thread:$0]  %s395_s0, 128, %s23_s15, [#allocation3]  }
  0x22   :  { %s316_s8 = smov [#allocation7]   ;;  %s264_s12 = scalar_lea.hbm %s397_s2, 256 }
  0x23   :  { %s46_s9 = sshll.u32 %s316_s8, 4  ;;  %p265_p2 = scmp.ne.s32.totalorder %s397_s2, %s264_s12  ;;  %s47_s9 = int_to_ptr.vmem [resolvable:$true] %s46_s9 }
  0x24   :  { %p268_p3 = scmp.lt.u32.totalorder %s264_s12, %s397_s2 }
  0x26   :  { %p270_p4 = pnand %p268_p3, %p265_p2 }
  0x28   :  { %273 = shalt.err (!%p270_p4)
}
  0x29   :  { %s274_s18 = scalar_lea.vmem %s47_s9, 256  ;;  %p279_p6 = scmp.lt.s32.totalorder %s47_s9, %s47_s9 }
  0x2a   :  { %p275_p5 = scmp.ne.s32.totalorder %s47_s9, %s274_s18  ;;  %p280_p7 = scmp.lt.s32.totalorder %s274_s18, %s274_s18 }
  0x2c   :  { %p281_p8 = por %p280_p7, %p279_p6 }
  0x2e   :  { %p282_p9 = pnand %p281_p8, %p275_p5 }
  0x30   :  { %285 = shalt.err (!%p282_p9)
}
  0x31   :  { %s317_s0 = smov 128   ;;  %s318_s15 = smov 8  }
  0x32   :  { %52 = dma.hbm_to_vmem [thread:$0]  %s397_s2, 256, %s47_s9, [#allocation6], %s317_s0, %s317_s0, %s318_s15  }
  0x33   :  { %308 = dma.done.wait [#allocation3], 128  }
  0x34   :  { %309 = vsyncadd [#allocation3], 4294967168 }
  0x35   :  { %310 = dma.done.wait [#allocation6], 384  }
  0x36   :  { %311 = vsyncadd [#allocation6], 4294966912  ;;  %v319_v0 = vmov 0   ;;  %v320_v1 = vmov 0.0|0.0   ;;  %vm72_vm0 = vcmask 261120   ;;  %v321_v2 = vmov 0.0  }
  0x37   :  { %219 = vset.pattern.permute.xlu0 %v319_v0  ;;  %204 = vmatprep.subr.bf16.mxu0 %v320_v1  ;;  %73 = vst.msk [vmem:[#allocation8] sm:$0xff] %vm72_vm0, %v321_v2  ;;  %vm89_vm1 = vcmask 1041408   ;;  %vm322_vm2 = vmmov 1   ;;  %v74_v3 = vld [vmem:[#allocation5] sm:$0xff]  ;;  %v83_v4 = vld [vmem:[#allocation7] sm:$0xff]  ;;  %vm323_vm4 = vmmov 0   ;;  %v75_v7 = vlaneseq }
  0x38   :  { %vm206_vm3 = vmpackc.low %vm89_vm1, %vm322_vm2  ;;  %v84_v5 = vld [vmem:[#allocation7 + $0x8] sm:$0x3]  ;;  %78 = vperm.xlu0 %219, %v74_v3   ;;  %201 = vmatprep.mubr.msk.f32.mxu0 %vm323_vm4, %v321_v2  ;;  %vm85_vm5 = vcmask 80896   ;;  %v163_v11 = vld [vmem:[#allocation2] sm:$0xff]  ;;  %s324_s2 = smov [#allocation8]  }
  0x39   :  { %v205_v6 = vpack.c.bf16 %v84_v5, %v83_v4  ;;  %v76_v8 = vand.u32 127, %v75_v7  ;;  %s177_s21 = sshll.u32 %s324_s2, 4  ;;  %s178_s21 = int_to_ptr.vmem [resolvable:$true] %s177_s21 }
  0x3a   :  { %s286_s22 = scalar_lea.vmem %s178_s21, 128  ;;  %p291_p11 = scmp.lt.s32.totalorder %s178_s21, %s178_s21 }
  0x3b   :  { %207 = vmatpush3.bf16.msk.msra.mxu0 %vm206_vm3, %v205_v6  ;;  %p287_p10 = scmp.ne.s32.totalorder %s178_s21, %s286_s22  ;;  %p292_p12 = scmp.lt.s32.totalorder %s286_s22, %s286_s22 }
  0x3d   :  { %p293_p13 = por %p292_p12, %p291_p11 }
  0x3e   :  { %v166_v15 = vld [vmem:[#allocation8] sm:$0xff] }
  0x3f   :  { %p294_p0 = pnand %p293_p13, %p287_p10 }
  0xb7   :  { %v79_v9 = vpop.permute.xlu0 %78 }
  0xb8   :  { %vm80_vm6 = vcmp.eq.s32.totalorder %v76_v8, %v79_v9 }
  0xb9   :  { %v191_v10 = vsel %vm80_vm6, 1.0, %v321_v2 }
  0xba   :  { %202 = vmatmul.mubr.msk.f32.vlgmr.msra.gmra.mrb[0].mxu0 %vm85_vm5, %v191_v10 }
 0x18d   :  { %v159_v12 = vpop.f32.mrb[0].mxu0 }
 0x18e   :  { %v164_v13 = vsub.f32 %v163_v11, %v159_v12  ;;  %v203_v14 = vpop.f32.mrb[1].mxu0 }
 0x190   :  { %v165_v16 = vmul.f32 %v164_v13, %v164_v13 }
 0x192   :  { %v168_v17 = vadd.f32 %v166_v15, %v165_v16 }
 0x194   :  { %170 = vst.msk [vmem:[#allocation8] sm:$0xff] %vm72_vm0, %v168_v17 }
 0x195   :  { %297 = shalt.err (!%p294_p0)
}
 0x196   :  { %s298_s25 = scalar_lea.hbm %s398_s3, 128 }
 0x197   :  { %p299_p1 = scmp.ne.s32.totalorder %s398_s3, %s298_s25  ;;  %p302_p2 = scmp.lt.u32.totalorder %s298_s25, %s398_s3 }
 0x199   :  { %p304_p3 = pnand %p302_p2, %p299_p1 }
 0x19b   :  { %307 = shalt.err (!%p304_p3)
}
 0x19c   :  { %180 = dma.vmem_to_hbm [thread:$0]  %s178_s21, 128, %s398_s3, [#allocation4]  }
 0x19d   :  { %312 = dma.done.wait [#allocation4], 128  }
 0x19e   :  { %313 = vsyncadd [#allocation4], 4294967168 }
 0x19f   :  { %184 = vsyncpa [#allocation3], 1 }
 0x1a0   :  { %185 = vsyncpa [#allocation6], 1 }
 0x1a1   :  { %186 = vsyncpa [#allocation4], 1 }

</bundles_post_ra>
